<compile_context>
chip_gen: v6e
topology: v6e:2x2x1
jax: 0.10.0
libtpu: 0.0.40
codegen_flags: <defaults>
</compile_context>

<pallas_src>
import functools

import jax
import jax.numpy as jnp
from jax.experimental import pallas as pl
from jax.experimental.pallas import tpu as pltpu


def _round_up(x, m):
    return (x + m - 1) // m * m


def _scale_shift(c_sum, c_sumsq, s_sum, s_sumsq, *, style_strength, eps, n):
    """Per-row (TR, 1) scale/shift so the apply phase is one FMA per element."""
    inv_n = 1.0 / n
    inv_nm1 = 1.0 / max(n - 1.0, 1.0)  # hw==1: std=0 (torch would be NaN)
    c_mean = c_sum * inv_n
    s_mean = s_sum * inv_n
    # var = (sumsq - n*mean^2) / (n-1); clamp >= 0 against cancellation.
    c_var = jnp.maximum(c_sumsq - c_sum * c_mean, 0.0) * inv_nm1
    s_var = jnp.maximum(s_sumsq - s_sum * s_mean, 0.0) * inv_nm1
    ratio = jnp.sqrt(s_var) / (jnp.sqrt(c_var) + eps)
    scale = (1.0 - style_strength) + style_strength * ratio
    shift = style_strength * (s_mean - c_mean * ratio)
    return scale, shift


# ----------------------------- fused path -----------------------------------


def _adain_fused_kernel(c_ref, s_ref, o_ref, *, style_strength, eps, n,
                        apply_in_io_dtype):
    c = c_ref[...]
    c32 = c.astype(jnp.float32)
    s32 = s_ref[...].astype(jnp.float32)

    # Single-pass stats: one XLU reduction pair per input, no dev temporaries.
    c_sum = jnp.sum(c32, axis=-1, keepdims=True)
    c_sumsq = jnp.sum(c32 * c32, axis=-1, keepdims=True)
    s_sum = jnp.sum(s32, axis=-1, keepdims=True)
    s_sumsq = jnp.sum(s32 * s32, axis=-1, keepdims=True)

    scale, shift = _scale_shift(c_sum, c_sumsq, s_sum, s_sumsq,
                                style_strength=style_strength, eps=eps, n=n)

    if apply_in_io_dtype:
        o_ref[...] = c * scale.astype(c.dtype) + shift.astype(c.dtype)
    else:
        o_ref[...] = (c32 * scale + shift).astype(o_ref.dtype)


# --------------------------- two-pass (tiled hw) path ------------------------


def _adain_stats_kernel(c_ref, s_ref, scale_ref, shift_ref,
                        c_sum_ref, c_sq_ref, s_sum_ref, s_sq_ref,
                        *, style_strength, eps, n):
    k = pl.program_id(1)

    @pl.when(k == 0)
    def _():
        c_sum_ref[...] = jnp.zeros_like(c_sum_ref)
        c_sq_ref[...] = jnp.zeros_like(c_sq_ref)
        s_sum_ref[...] = jnp.zeros_like(s_sum_ref)
        s_sq_ref[...] = jnp.zeros_like(s_sq_ref)

    c = c_ref[...].astype(jnp.float32)
    s = s_ref[...].astype(jnp.float32)
    c_sum_ref[...] += jnp.sum(c, axis=-1, keepdims=True)
    c_sq_ref[...] += jnp.sum(c * c, axis=-1, keepdims=True)
    s_sum_ref[...] += jnp.sum(s, axis=-1, keepdims=True)
    s_sq_ref[...] += jnp.sum(s * s, axis=-1, keepdims=True)

    @pl.when(k == pl.num_programs(1) - 1)
    def _():
        scale, shift = _scale_shift(c_sum_ref[...], c_sq_ref[...],
                                    s_sum_ref[...], s_sq_ref[...],
                                    style_strength=style_strength, eps=eps, n=n)
        scale_ref[...] = scale
        shift_ref[...] = shift


def _adain_apply_kernel(c_ref, scale_ref, shift_ref, o_ref, *, apply_in_io_dtype):
    c = c_ref[...]
    scale = scale_ref[...]
    shift = shift_ref[...]
    if apply_in_io_dtype:
        o_ref[...] = c * scale.astype(c.dtype) + shift.astype(c.dtype)
    else:
        o_ref[...] = (c.astype(jnp.float32) * scale + shift).astype(o_ref.dtype)


# --------------------------------- wrapper -----------------------------------


def _pad2d(x, rows_p, cols_p):
    r, c = x.shape
    if r == rows_p and c == cols_p:
        return x
    return jnp.pad(x, ((0, rows_p - r), (0, cols_p - c)))


def adain(content, style, style_strength=1.0, eps=1e-5,
          vmem_budget_bytes=None, spatial_chunk=None, force_two_pass=False):
    """content, style: (B, C, H, W) arrays (NCHW, matching the PyTorch module)."""
    b, c, h, w = content.shape
    assert style.shape == content.shape

    # Fast path: the blend is a no-op.
    if isinstance(style_strength, (int, float)) and float(style_strength) == 0.0:
        return content

    rows = b * c
    hw = h * w
    dtype = content.dtype
    itemsize = jnp.dtype(dtype).itemsize
    pack = max(1, 4 // itemsize)
    sub = 8 * pack          # packed sublane multiple: 8 f32 / 16 bf16 / 32 int8
    lane_mult = 128 * pack  # lane-dense last-dim multiple

    # Generation-aware VMEM sizing (~3/8 of physical for tiles, 3/4 for limit).
    try:
        info = pltpu.get_tpu_info()
        vmem_cap = int(getattr(info, "vmem_capacity_bytes", 64 << 20))
    except Exception:  # pragma: no cover - conservative fallback
        vmem_cap = 64 << 20
    if vmem_budget_bytes is None:
        vmem_budget_bytes = (vmem_cap * 3) // 8
    vmem_limit_bytes = (vmem_cap * 3) // 4

    apply_in_io_dtype = dtype in (jnp.bfloat16, jnp.float16)

    hw_pad = _round_up(hw, lane_mult)
    rows_rounded = _round_up(rows, sub)

    content2d = content.reshape(rows, hw)
    style2d = style.reshape(rows, hw)

    style_strength = float(style_strength)
    eps = float(eps)

    # Fused path sizing: 2 inputs + 1 output, double-buffered, + ~2 f32 temps.
    bytes_per_row_fused = 3 * 2 * hw_pad * itemsize + 2 * hw_pad * 4
    tr_fused = (vmem_budget_bytes // bytes_per_row_fused) // sub * sub
    use_fused = (not force_two_pass) and tr_fused >= sub

    if use_fused:
        tr = min(tr_fused, rows_rounded)
        num_row_steps = pl.cdiv(rows, tr)
        rows_p = num_row_steps * tr

        cpad = _pad2d(content2d, rows_p, hw_pad)
        spad = _pad2d(style2d, rows_p, hw_pad)

        kernel = functools.partial(
            _adain_fused_kernel, style_strength=style_strength, eps=eps,
            n=float(hw), apply_in_io_dtype=apply_in_io_dtype)

        out2d = pl.pallas_call(
            kernel,
            out_shape=jax.ShapeDtypeStruct((rows_p, hw_pad), dtype),
            grid_spec=pltpu.PrefetchScalarGridSpec(
                num_scalar_prefetch=0,
                grid=(num_row_steps,),
                in_specs=[
                    pl.BlockSpec((tr, hw_pad), lambda i: (i, 0)),
                    pl.BlockSpec((tr, hw_pad), lambda i: (i, 0)),
                ],
                out_specs=pl.BlockSpec((tr, hw_pad), lambda i: (i, 0)),
            ),
            input_output_aliases={0: 0},  # donate content as the output buffer
            compiler_params=pltpu.CompilerParams(
                dimension_semantics=("parallel",),
                vmem_limit_bytes=vmem_limit_bytes,
            ),
        )(cpad, spad)
    else:
        # Two-pass spatially tiled path for large H*W.
        thw_target = spatial_chunk if spatial_chunk is not None else 4096
        thw = max(lane_mult, min(_round_up(thw_target, lane_mult), hw_pad))
        hw_pp = _round_up(hw_pad, thw)
        n_chunks = hw_pp // thw

        bytes_per_row_tiled = 2 * 2 * thw * itemsize + 2 * thw * 4
        tr = max(sub, (vmem_budget_bytes // bytes_per_row_tiled) // sub * sub)
        tr = min(tr, rows_rounded)
        num_row_steps = pl.cdiv(rows, tr)
        rows_p = num_row_steps * tr

        cpad = _pad2d(content2d, rows_p, hw_pp)
        spad = _pad2d(style2d, rows_p, hw_pp)

        stats_kernel = functools.partial(
            _adain_stats_kernel, style_strength=style_strength, eps=eps,
            n=float(hw))

        scale2d, shift2d = pl.pallas_call(
            stats_kernel,
            out_shape=(jax.ShapeDtypeStruct((rows_p, 1), jnp.float32),
                       jax.ShapeDtypeStruct((rows_p, 1), jnp.float32)),
            grid_spec=pltpu.PrefetchScalarGridSpec(
                num_scalar_prefetch=0,
                grid=(num_row_steps, n_chunks),
                in_specs=[
                    pl.BlockSpec((tr, thw), lambda i, k: (i, k)),
                    pl.BlockSpec((tr, thw), lambda i, k: (i, k)),
                ],
                out_specs=(pl.BlockSpec((tr, 1), lambda i, k: (i, 0)),
                           pl.BlockSpec((tr, 1), lambda i, k: (i, 0))),
                scratch_shapes=[pltpu.VMEM((tr, 1), jnp.float32)] * 4,
            ),
            compiler_params=pltpu.CompilerParams(
                dimension_semantics=("parallel", "arbitrary"),
                vmem_limit_bytes=vmem_limit_bytes,
            ),
        )(cpad, spad)

        apply_kernel = functools.partial(
            _adain_apply_kernel, apply_in_io_dtype=apply_in_io_dtype)

        out2d = pl.pallas_call(
            apply_kernel,
            out_shape=jax.ShapeDtypeStruct((rows_p, hw_pp), dtype),
            grid_spec=pltpu.PrefetchScalarGridSpec(
                num_scalar_prefetch=0,
                grid=(num_row_steps, n_chunks),
                in_specs=[
                    pl.BlockSpec((tr, thw), lambda i, k: (i, k)),
                    pl.BlockSpec((tr, 1), lambda i, k: (i, 0)),
                    pl.BlockSpec((tr, 1), lambda i, k: (i, 0)),
                ],
                out_specs=pl.BlockSpec((tr, thw), lambda i, k: (i, k)),
            ),
            input_output_aliases={0: 0},  # donate content as the output buffer
            compiler_params=pltpu.CompilerParams(
                dimension_semantics=("parallel", "parallel"),
                vmem_limit_bytes=vmem_limit_bytes,
            ),
        )(cpad, scale2d, shift2d)

    if out2d.shape != (rows, hw):
        out2d = out2d[:rows, :hw]
    return out2d.reshape(b, c, h, w)


def _adain_reference(content, style, style_strength=1.0, eps=1e-5):
    b, c, h, w = content.shape
    cf = content.reshape(b, c, -1)
    sf = style.reshape(b, c, -1)
    c_mean = jnp.mean(cf, axis=2, keepdims=True)
    c_std = jnp.std(cf, axis=2, keepdims=True, ddof=1)
    s_mean = jnp.mean(sf, axis=2, keepdims=True)
    s_std = jnp.std(sf, axis=2, keepdims=True, ddof=1)
    normalized = (cf - c_mean) / (c_std + eps)
    stylized = (normalized * s_std + s_mean).reshape(b, c, h, w)
    return (1 - style_strength) * content + style_strength * stylized


if __name__ == "__main__":
    key = jax.random.PRNGKey(0)
    k1, k2, k3, k4, k5, k6 = jax.random.split(key, 6)

    # Check 1: B=2, C=4, H=W=16 (rows=8, hw=256, lane-dense) -> fused path.
    B, C, H, W = 2, 4, 16, 16
    content = jax.random.normal(k1, (B, C, H, W), dtype=jnp.float32)
    style = jax.random.normal(k2, (B, C, H, W), dtype=jnp.float32) * 2.0 + 0.5
    out = jax.block_until_ready(adain(content, style, style_strength=0.8, eps=1e-5))
    ref = _adain_reference(content, style, style_strength=0.8, eps=1e-5)
    assert out.shape == (B, C, H, W)
    assert jnp.allclose(out, ref, atol=1e-5, rtol=1e-5), float(
        jnp.max(jnp.abs(out - ref)))

    # Check 2: C=3, H=W=8 (rows=6, hw=64) -> exercises row + lane padding.
    B2, C2, H2, W2 = 2, 3, 8, 8
    content2 = jax.random.normal(k3, (B2, C2, H2, W2), dtype=jnp.float32)
    style2 = jax.random.normal(k4, (B2, C2, H2, W2), dtype=jnp.float32) * 0.5 - 1.0
    out2 = jax.block_until_ready(adain(content2, style2, style_strength=0.3, eps=1e-5))
    ref2 = _adain_reference(content2, style2, style_strength=0.3, eps=1e-5)
    assert out2.shape == (B2, C2, H2, W2)
    assert jnp.allclose(out2, ref2, atol=1e-5, rtol=1e-5), float(
        jnp.max(jnp.abs(out2 - ref2)))

    # Check 3: force the two-pass spatially tiled (large-image) code path.
    B3, C3, H3, W3 = 1, 4, 32, 32
    content3 = jax.random.normal(k5, (B3, C3, H3, W3), dtype=jnp.float32)
    style3 = jax.random.normal(k6, (B3, C3, H3, W3), dtype=jnp.float32) * 1.5 + 0.25
    out3 = jax.block_until_ready(
        adain(content3, style3, style_strength=0.6, eps=1e-5,
              force_two_pass=True, spatial_chunk=256))
    ref3 = _adain_reference(content3, style3, style_strength=0.6, eps=1e-5)
    assert out3.shape == (B3, C3, H3, W3)
    assert jnp.allclose(out3, ref3, atol=1e-5, rtol=1e-5), float(
        jnp.max(jnp.abs(out3 - ref3)))

    print("KERNEL_OK")
</pallas_src>

<mosaic_0001>
module attributes {stable_mosaic.version = 11 : i64} {
  func.func @_adain_fused_kernel(%arg0: i32, %arg1: memref<8x256xf32, #tpu.memory_space<vmem>>, %arg2: memref<8x256xf32, #tpu.memory_space<vmem>>, %arg3: memref<8x256xf32, #tpu.memory_space<vmem>>) attributes {dimension_semantics = [#tpu.dimension_semantics<parallel>], iteration_bounds = array<i64: 1>, scalar_prefetch = 0 : i64, scratch_operands = 0 : i64, tpu.core_type = #tpu.core_type<tc>, window_params = [{transform_indices = @transform_0, window_bounds = array<i64: 8, 256>}, {transform_indices = @transform_1, window_bounds = array<i64: 8, 256>}, {transform_indices = @transform_2, window_bounds = array<i64: 8, 256>}]} {
    %c0 = arith.constant 0 : index
    %c0_0 = arith.constant 0 : index
    %0 = vector.load %arg1[%c0, %c0_0] : memref<8x256xf32, #tpu.memory_space<vmem>>, vector<8x256xf32>
    %c0_1 = arith.constant 0 : index
    %c0_2 = arith.constant 0 : index
    %1 = vector.load %arg2[%c0_1, %c0_2] : memref<8x256xf32, #tpu.memory_space<vmem>>, vector<8x256xf32>
    %cst = arith.constant dense<0.000000e+00> : vector<8xf32>
    %2 = vector.multi_reduction <add>, %0, %cst [1] : vector<8x256xf32> to vector<8xf32>
    %3 = vector.shape_cast %2 : vector<8xf32> to vector<8x1xf32>
    %4 = arith.mulf %0, %0 : vector<8x256xf32>
    %cst_3 = arith.constant dense<0.000000e+00> : vector<8xf32>
    %5 = vector.multi_reduction <add>, %4, %cst_3 [1] : vector<8x256xf32> to vector<8xf32>
    %6 = vector.shape_cast %5 : vector<8xf32> to vector<8x1xf32>
    %cst_4 = arith.constant dense<0.000000e+00> : vector<8xf32>
    %7 = vector.multi_reduction <add>, %1, %cst_4 [1] : vector<8x256xf32> to vector<8xf32>
    %8 = vector.shape_cast %7 : vector<8xf32> to vector<8x1xf32>
    %9 = arith.mulf %1, %1 : vector<8x256xf32>
    %cst_5 = arith.constant dense<0.000000e+00> : vector<8xf32>
    %10 = vector.multi_reduction <add>, %9, %cst_5 [1] : vector<8x256xf32> to vector<8xf32>
    %11 = vector.shape_cast %10 : vector<8xf32> to vector<8x1xf32>
    %cst_6 = arith.constant 3.906250e-03 : f32
    %12 = vector.broadcast %cst_6 : f32 to vector<8x1xf32>
    %13 = arith.mulf %3, %12 : vector<8x1xf32>
    %cst_7 = arith.constant 3.906250e-03 : f32
    %14 = vector.broadcast %cst_7 : f32 to vector<8x1xf32>
    %15 = arith.mulf %8, %14 : vector<8x1xf32>
    %16 = arith.mulf %3, %13 : vector<8x1xf32>
    %17 = arith.subf %6, %16 : vector<8x1xf32>
    %cst_8 = arith.constant 0.000000e+00 : f32
    %18 = vector.broadcast %cst_8 : f32 to vector<8x1xf32>
    %19 = arith.maximumf %17, %18 : vector<8x1xf32>
    %cst_9 = arith.constant 0.00392156886 : f32
    %20 = vector.broadcast %cst_9 : f32 to vector<8x1xf32>
    %21 = arith.mulf %19, %20 : vector<8x1xf32>
    %22 = arith.mulf %8, %15 : vector<8x1xf32>
    %23 = arith.subf %11, %22 : vector<8x1xf32>
    %cst_10 = arith.constant 0.000000e+00 : f32
    %24 = vector.broadcast %cst_10 : f32 to vector<8x1xf32>
    %25 = arith.maximumf %23, %24 : vector<8x1xf32>
    %cst_11 = arith.constant 0.00392156886 : f32
    %26 = vector.broadcast %cst_11 : f32 to vector<8x1xf32>
    %27 = arith.mulf %25, %26 : vector<8x1xf32>
    %28 = math.sqrt %27 : vector<8x1xf32>
    %29 = math.sqrt %21 : vector<8x1xf32>
    %cst_12 = arith.constant 9.99999974E-6 : f32
    %30 = vector.broadcast %cst_12 : f32 to vector<8x1xf32>
    %31 = arith.addf %29, %30 : vector<8x1xf32>
    %32 = arith.divf %28, %31 : vector<8x1xf32>
    %cst_13 = arith.constant 8.000000e-01 : f32
    %33 = vector.broadcast %cst_13 : f32 to vector<8x1xf32>
    %34 = arith.mulf %33, %32 : vector<8x1xf32>
    %cst_14 = arith.constant 2.000000e-01 : f32
    %35 = vector.broadcast %cst_14 : f32 to vector<8x1xf32>
    %36 = arith.addf %35, %34 : vector<8x1xf32>
    %37 = arith.mulf %13, %32 : vector<8x1xf32>
    %38 = arith.subf %15, %37 : vector<8x1xf32>
    %cst_15 = arith.constant 8.000000e-01 : f32
    %39 = vector.broadcast %cst_15 : f32 to vector<8x1xf32>
    %40 = arith.mulf %39, %38 : vector<8x1xf32>
    %41 = vector.broadcast %36 : vector<8x1xf32> to vector<8x256xf32>
    %42 = arith.mulf %0, %41 : vector<8x256xf32>
    %43 = vector.broadcast %40 : vector<8x1xf32> to vector<8x256xf32>
    %44 = arith.addf %42, %43 : vector<8x256xf32>
    %c0_16 = arith.constant 0 : index
    %c0_17 = arith.constant 0 : index
    %45 = vector.load %arg3[%c0_16, %c0_17] : memref<8x256xf32, #tpu.memory_space<vmem>>, vector<8x256xf32>
    tpu.vector_store %arg3[%c0_16, %c0_17], %44 {strides = array<i32>} : memref<8x256xf32, #tpu.memory_space<vmem>>, vector<8x256xf32>,
    return
  }
  func.func @transform_0(%arg0: i32) -> (i32, i32) {
    %c0_i32 = arith.constant 0 : i32
    %c0_i32_0 = arith.constant 0 : i32
    return %arg0, %c0_i32 : i32, i32
  }
  func.func @transform_1(%arg0: i32) -> (i32, i32) {
    %c0_i32 = arith.constant 0 : i32
    %c0_i32_0 = arith.constant 0 : i32
    return %arg0, %c0_i32 : i32, i32
  }
  func.func @transform_2(%arg0: i32) -> (i32, i32) {
    %c0_i32 = arith.constant 0 : i32
    %c0_i32_0 = arith.constant 0 : i32
    return %arg0, %c0_i32 : i32, i32
  }
}

</mosaic_0001>

<bundles_post_ra>
// kernel: tpu_custom_call.1
= control target key start
LH: loop header
LB: loop body
LE: loop exit
PB: predicated region body
PF: predicated region fallthrough
CT: control target
= control target key end

     0   :  { %7 = vsyncpa [#allocation3], 0  ;;  %s178_s0 = inlined_call_operand.hbm [shape: f32[8,256], index: 0, kind: input, shape index: {}, may-alias: {0,2}]   ;;  %s179_s1 = inlined_call_operand.vmem [shape: f32[8,256], index: 1, kind: input, shape index: {}]   ;;  %s180_s2 = inlined_call_operand.hbm [shape: f32[8,256], index: 2, kind: output, shape index: {}, may-alias: {0,2}]  }
   0x1   :  { %8 = vsyncpa [#allocation4], 0  ;;  %s149_s9 = smov [#allocation2]  }
   0x2   :  { %s15_s10 = sshll.u32 %s149_s9, 4  ;;  %s16_s10 = int_to_ptr.vmem [resolvable:$true] %s15_s10 }
   0x3   :  { %s113_s11 = scalar_lea.vmem %s16_s10, 256  ;;  %p118_p1 = scmp.lt.s32.totalorder %s16_s10, %s16_s10 }
   0x4   :  { %p114_p0 = scmp.ne.s32.totalorder %s16_s10, %s113_s11  ;;  %p119_p2 = scmp.lt.s32.totalorder %s113_s11, %s113_s11 }
   0x6   :  { %p120_p3 = por %p119_p2, %p118_p1 }
   0x8   :  { %p121_p4 = pnand %p120_p3, %p114_p0 }
   0xa   :  { %124 = shalt.err (!%p121_p4)
}
   0xb   :  { %18 = dma.hbm_to_vmem [thread:$0]  %s178_s0, 256, %s16_s10, [#allocation3]  }
   0xc   :  { %145 = dma.done.wait [#allocation3], 256  }
   0xd   :  { %146 = vsyncadd [#allocation3], 4294967040  ;;  %v26_v0 = vld [vmem:[%s179_s1] sm:$0xff]  ;;  %v27_v1 = vld [vmem:[%s179_s1 + $0x8] sm:$0xff]  ;;  %s150_s0 = smov [#allocation5]  }
   0xe   :  { %v24_v2 = vld [vmem:[#allocation2] sm:$0xff]  ;;  %v36_v3 = vadd.f32 %v27_v1, %v26_v0  ;;  %v39_v4 = vmul.f32 %v26_v0, %v26_v0  ;;  %v40_v5 = vmul.f32 %v27_v1, %v27_v1  ;;  %v25_v6 = vld [vmem:[#allocation2 + $0x8] sm:$0xff]  ;;  %s88_s1 = sshll.u32 %s150_s0, 4  ;;  %s89_s1 = int_to_ptr.vmem [resolvable:$true] %s88_s1 }
   0xf   :  { %v31_v7 = vmul.f32 %v24_v2, %v24_v2  ;;  %v28_v8 = vadd.f32 %v25_v6, %v24_v2  ;;  %v32_v9 = vmul.f32 %v25_v6, %v25_v6  ;;  %s125_s18 = scalar_lea.vmem %s89_s1, 256  ;;  %p130_p6 = scmp.lt.s32.totalorder %s89_s1, %s89_s1 }
  0x10   :  { %37 = vadd.xlane.f32.xlu1 %v36_v3  ;;  %v41_v10 = vadd.f32 %v40_v5, %v39_v4  ;;  %p126_p5 = scmp.ne.s32.totalorder %s89_s1, %s125_s18  ;;  %p131_p7 = scmp.lt.s32.totalorder %s125_s18, %s125_s18 }
  0x11   :  { %29 = vadd.xlane.f32.xlu0 %v28_v8  ;;  %v33_v11 = vadd.f32 %v32_v9, %v31_v7 }
  0x12   :  { %p132_p8 = por %p131_p7, %p130_p6 }
  0x14   :  { %42 = vadd.xlane.f32.xlu1 %v41_v10  ;;  %p133_p9 = pnand %p132_p8, %p126_p5 }
  0x15   :  { %34 = vadd.xlane.f32.xlu0 %v33_v11 }
  0x99   :  { %v38_v12 = vpop.xlane.xlu1 %37 }
  0x9a   :  { %v30_v13 = vpop.xlane.xlu0 %29  ;;  %v45_v14 = vmul.f32 0.00390625, %v38_v12 }
  0x9b   :  { %v44_v15 = vmul.f32 0.00390625, %v30_v13 }
  0x9c   :  { %v50_v18 = vmul.f32 %v45_v14, %v38_v12 }
  0x9d   :  { %v46_v16 = vmul.f32 %v44_v15, %v30_v13  ;;  %v43_v20 = vpop.xlane.xlu1 %42 }
  0x9e   :  { %v35_v17 = vpop.xlane.xlu0 %34  ;;  %v51_v22 = vsub.f32 %v43_v20, %v50_v18 }
  0x9f   :  { %v47_v19 = vsub.f32 %v35_v17, %v46_v16 }
  0xa0   :  { %v52_v24 = vmax.f32 %v51_v22, 0.0 }
  0xa1   :  { %v48_v21 = vmax.f32 %v47_v19, 0.0 }
  0xa2   :  { %v53_v25 = vmul.f32 0.003921569, %v52_v24 }
  0xa3   :  { %v49_v23 = vmul.f32 0.003921569, %v48_v21 }
  0xa4   :  { %vm56_vm2 = vcmp.eq.f32.partialorder %v53_v25, inf  ;;  %v59_v34 = vand.u32 2147483648, %v53_v25  ;;  %vm58_vm3 = vcmp.eq.f32.partialorder %v53_v25, 0.0 }
  0xa5   :  { %99 = vrsqrt.f32 %v49_v23  ;;  %vm63_vm0 = vcmp.eq.f32.partialorder %v49_v23, inf  ;;  %v66_v28 = vand.u32 2147483648, %v49_v23  ;;  %vm65_vm1 = vcmp.eq.f32.partialorder %v49_v23, 0.0 }
  0xa6   :  { %101 = vrsqrt.f32 %v53_v25 }
  0xb2   :  { %v100_v26 = vpop.eup %99 }
  0xb3   :  { %v62_v27 = vmul.f32 %v100_v26, %v49_v23  ;;  %v102_v32 = vpop.eup %101 }
  0xb4   :  { %v55_v33 = vmul.f32 %v102_v32, %v53_v25 }
  0xb5   :  { %v64_v29 = vsel %vm63_vm0, %v49_v23, %v62_v27 }
  0xb6   :  { %v67_v30 = vsel %vm65_vm1, %v66_v28, %v64_v29  ;;  %v57_v35 = vsel %vm56_vm2, %v53_v25, %v55_v33 }
  0xb7   :  { %v68_v31 = vadd.f32 1e-05, %v67_v30  ;;  %v60_v37 = vsel %vm58_vm3, %v59_v34, %v57_v35 }
  0xb9   :  { %103 = vrcp.f32 %v68_v31 }
  0xc6   :  { %v104_v36 = vpop.eup %103 }
  0xc7   :  { %v70_v38 = vmul.f32 %v104_v36, %v60_v37 }
  0xc9   :  { %v71_v39 = vmul.f32 0.8, %v70_v38  ;;  %v73_v40 = vmul.f32 %v70_v38, %v44_v15 }
  0xcb   :  { %v72_v41 = vadd.f32 0.2, %v71_v39  ;;  %v74_v42 = vsub.f32 %v45_v14, %v73_v40 }
  0xcd   :  { %v75_v43 = vmul.f32 0.8, %v74_v42  ;;  %v76_v44 = vmul.f32 %v72_v41, %v24_v2  ;;  %v77_v45 = vmul.f32 %v72_v41, %v25_v6 }
  0xcf   :  { %v78_v46 = vadd.f32 %v76_v44, %v75_v43  ;;  %v79_v47 = vadd.f32 %v77_v45, %v75_v43 }
  0xd1   :  { %80 = vst [vmem:[#allocation5] sm:$0xff] %v78_v46  ;;  %81 = vst [vmem:[#allocation5 + $0x8] sm:$0xff] %v79_v47 }
  0xd2   :  { %136 = shalt.err (!%p133_p9)
}
  0xd3   :  { %91 = dma.vmem_to_hbm [thread:$0]  %s89_s1, 256, %s180_s2, [#allocation4]  }
  0xd4   :  { %147 = dma.done.wait [#allocation4], 256  }
  0xd5   :  { %148 = vsyncadd [#allocation4], 4294967040 }
  0xd6   :  { %95 = vsyncpa [#allocation3], 1 }
  0xd7   :  { %96 = vsyncpa [#allocation4], 1 }

</bundles_post_ra>
